<compile_context>
chip_gen: v7x
topology: tpu7x:2x2x1
jax: 0.10.0
libtpu: 0.0.40
codegen_flags: <defaults>
</compile_context>

<pallas_src>
import jax
import jax.numpy as jnp
from jax import lax
from jax.experimental import pallas as pl
from jax.experimental.pallas import tpu as pltpu


def _batch_cosine_sim_kernel(x1_ref, x2_ref, o_ref):
    # x1_ref: (BB, TS1, H), x2_ref: (BB, TS2, H), o_ref: (BB, TS1, TS2)
    x1 = x1_ref[...]
    x2 = x2_ref[...]

    eps_sq = jnp.float32(1e-16)  # ~ (1e-8)^2, folded inside rsqrt per operand

    # Inverse L2 norms along hidden, accumulated in f32.
    x1f = x1.astype(jnp.float32)
    x2f = x2.astype(jnp.float32)
    inv1 = lax.rsqrt(jnp.sum(x1f * x1f, axis=-1, keepdims=True) + eps_sq)  # (BB, TS1, 1)
    inv2 = lax.rsqrt(jnp.sum(x2f * x2f, axis=-1, keepdims=True) + eps_sq)  # (BB, TS2, 1)

    # Pre-scale operands, then a single batched matmul contracting the last
    # dims (native MXU path for bf16 inputs; no-op casts for f32).
    x1s = (x1f * inv1).astype(x1.dtype)
    x2s = (x2f * inv2).astype(x2.dtype)
    out = jnp.einsum("bqh,bkh->bqk", x1s, x2s,
                     preferred_element_type=jnp.float32)
    o_ref[...] = out.astype(o_ref.dtype)


def _round_up(x, m):
    return ((x + m - 1) // m) * m


def _largest_tile(total, align, cap):
    """Largest t <= cap with t % align == 0 and total % t == 0 (total % align == 0)."""
    t = min(total, max(align, (cap // align) * align))
    while total % t:
        t -= align
    return t


def batch_cosine_similarity(input1, input2, *, block_budget_bytes=4 * 1024 * 1024):
    """input1: [B, S1, H], input2: [B, S2, H] -> [B, S1, S2]."""
    B, S1, H = input1.shape
    B2, S2, H2 = input2.shape
    assert B == B2 and H == H2

    out_dtype = jnp.result_type(input1.dtype, input2.dtype)
    in_bytes = max(jnp.dtype(input1.dtype).itemsize, jnp.dtype(input2.dtype).itemsize)
    out_bytes = jnp.dtype(out_dtype).itemsize

    # Pad S1 to a multiple of 8 (sublane) and S2 to a multiple of 128 (lane).
    # Padded rows/cols are all-zero -> their cosine entries are 0 and are
    # sliced off below.
    S1p = _round_up(S1, 8)
    S2p = _round_up(S2, 128)
    x1 = input1 if S1p == S1 else jnp.pad(input1, ((0, 0), (0, S1p - S1), (0, 0)))
    x2 = input2 if S2p == S2 else jnp.pad(input2, ((0, 0), (0, S2p - S2), (0, 0)))

    def blk_bytes(ts1, ts2, bb=1):
        return bb * ((ts1 * H + ts2 * H) * in_bytes + ts1 * ts2 * out_bytes)

    # Tile S1 (output rows); cap at 512 so long sequences stay a modest VMEM slice.
    TS1 = _largest_tile(S1p, 8, 512)

    # Tile S2 only when the full-S2 block would overflow the budget, so x2
    # stays resident (its block index is constant across the inner grid axis).
    TS2 = S2p
    while TS2 > 128 and blk_bytes(TS1, TS2) > block_budget_bytes:
        TS2 -= 128
        while S2p % TS2:
            TS2 -= 128
    ns1 = S1p // TS1
    ns2 = S2p // TS2

    # Fuse batches per grid step, but keep >= 2 grid steps when B >= 2
    # (megacore sharding of the "parallel" batch axis).
    BB = max(1, min(B, block_budget_bytes // max(blk_bytes(TS1, TS2), 1)))
    if ns1 * ns2 == 1 and B >= 2:
        BB = min(BB, -(-B // 2))  # ceil(B/2): at least 2 batch blocks
    while B % BB:                 # keep blocks evenly dividing B
        BB -= 1
    nb = B // BB

    # TODO(synk): for extremely large H (single H slab per block > VMEM) add an
    # inner H reduction with a VMEM accumulator; not needed for RNN hidden sizes.
    out_padded = pl.pallas_call(
        _batch_cosine_sim_kernel,
        out_shape=jax.ShapeDtypeStruct((B, S1p, S2p), out_dtype),
        grid_spec=pltpu.PrefetchScalarGridSpec(
            num_scalar_prefetch=0,
            grid=(nb, ns1, ns2),
            in_specs=[
                pl.BlockSpec((BB, TS1, H), lambda b, i, j: (b, i, 0)),
                pl.BlockSpec((BB, TS2, H), lambda b, i, j: (b, j, 0)),
            ],
            out_specs=pl.BlockSpec((BB, TS1, TS2), lambda b, i, j: (b, i, j)),
        ),
        compiler_params=pltpu.CompilerParams(
            dimension_semantics=("parallel", "parallel", "parallel"),
            vmem_limit_bytes=32 * 1024 * 1024,
        ),
    )(x1, x2)

    if S1p != S1 or S2p != S2:
        out_padded = out_padded[:, :S1, :S2]
    return out_padded


def _reference(input1, input2):
    dot = jnp.einsum("bsh,bth->bst", input1, input2)
    n1 = jnp.linalg.norm(input1, axis=-1)
    n2 = jnp.linalg.norm(input2, axis=-1)
    norm_matrix = n1[:, :, None] * n2[:, None, :] + 1e-8
    return dot / norm_matrix


if __name__ == "__main__":
    key = jax.random.PRNGKey(0)
    k1, k2 = jax.random.split(key)

    B, S1, S2, H = 2, 8, 8, 32
    input1 = jax.random.normal(k1, (B, S1, H), dtype=jnp.float32)
    input2 = jax.random.normal(k2, (B, S2, H), dtype=jnp.float32)

    out = batch_cosine_similarity(input1, input2)
    out = jax.block_until_ready(out)

    ref = _reference(input1, input2)
    assert out.shape == (B, S1, S2)
    max_err = float(jnp.max(jnp.abs(out - ref)))
    assert jnp.allclose(out, ref, atol=1e-4, rtol=1e-4), max_err

    print("KERNEL_OK")
</pallas_src>

<mosaic_0001>
module attributes {stable_mosaic.version = 11 : i64} {
  func.func @_batch_cosine_sim_kernel(%arg0: i32, %arg1: i32, %arg2: i32, %arg3: memref<1x8x32xf32, #tpu.memory_space<vmem>>, %arg4: memref<1x128x32xf32, #tpu.memory_space<vmem>>, %arg5: memref<1x8x128xf32, #tpu.memory_space<vmem>>) attributes {dimension_semantics = [#tpu.dimension_semantics<parallel>, #tpu.dimension_semantics<parallel>, #tpu.dimension_semantics<parallel>], iteration_bounds = array<i64: 2, 1, 1>, scalar_prefetch = 0 : i64, scratch_operands = 0 : i64, tpu.core_type = #tpu.core_type<tc>, window_params = [{transform_indices = @transform_0, window_bounds = array<i64: 1, 8, 32>}, {transform_indices = @transform_1, window_bounds = array<i64: 1, 128, 32>}, {transform_indices = @transform_2, window_bounds = array<i64: 1, 8, 128>}]} {
    %c0 = arith.constant 0 : index
    %c0_0 = arith.constant 0 : index
    %c0_1 = arith.constant 0 : index
    %0 = vector.load %arg3[%c0, %c0_0, %c0_1] : memref<1x8x32xf32, #tpu.memory_space<vmem>>, vector<1x8x32xf32>
    %c0_2 = arith.constant 0 : index
    %c0_3 = arith.constant 0 : index
    %c0_4 = arith.constant 0 : index
    %1 = vector.load %arg4[%c0_2, %c0_3, %c0_4] : memref<1x128x32xf32, #tpu.memory_space<vmem>>, vector<1x128x32xf32>
    %2 = arith.mulf %0, %0 : vector<1x8x32xf32>
    %cst = arith.constant dense<0.000000e+00> : vector<1x8xf32>
    %3 = vector.multi_reduction <add>, %2, %cst [2] : vector<1x8x32xf32> to vector<1x8xf32>
    %4 = vector.shape_cast %3 : vector<1x8xf32> to vector<1x8x1xf32>
    %cst_5 = arith.constant 1.000000e-16 : f32
    %5 = vector.broadcast %cst_5 : f32 to vector<1x8x1xf32>
    %6 = arith.addf %4, %5 : vector<1x8x1xf32>
    %7 = math.rsqrt %6 : vector<1x8x1xf32>
    %8 = arith.mulf %1, %1 : vector<1x128x32xf32>
    %cst_6 = arith.constant dense<0.000000e+00> : vector<1x128xf32>
    %9 = vector.multi_reduction <add>, %8, %cst_6 [2] : vector<1x128x32xf32> to vector<1x128xf32>
    %10 = vector.shape_cast %9 : vector<1x128xf32> to vector<1x128x1xf32>
    %cst_7 = arith.constant 1.000000e-16 : f32
    %11 = vector.broadcast %cst_7 : f32 to vector<1x128x1xf32>
    %12 = arith.addf %10, %11 : vector<1x128x1xf32>
    %13 = math.rsqrt %12 : vector<1x128x1xf32>
    %14 = vector.broadcast %7 : vector<1x8x1xf32> to vector<1x8x32xf32>
    %15 = arith.mulf %0, %14 : vector<1x8x32xf32>
    %16 = vector.broadcast %13 : vector<1x128x1xf32> to vector<1x128x32xf32>
    %17 = arith.mulf %1, %16 : vector<1x128x32xf32>
    "tpu.trace_start"() <{level = 10 : i32, message = "bqh,bkh->bqk"}> : () -> ()
    %cst_8 = arith.constant dense<0.000000e+00> : vector<1x8x128xf32>
    %18 = tpu.matmul %15, %17, %cst_8 {dimension_numbers = #tpu.dot_dimension_numbers<[2], [2], [1], [1], [0, 0, 0, 1, 1, 1], [0], [0]>} : vector<1x8x32xf32>, vector<1x128x32xf32>, vector<1x8x128xf32> -> vector<1x8x128xf32>
    "tpu.trace_stop"() : () -> ()
    %c0_9 = arith.constant 0 : index
    %c0_10 = arith.constant 0 : index
    %c0_11 = arith.constant 0 : index
    %19 = vector.load %arg5[%c0_9, %c0_10, %c0_11] : memref<1x8x128xf32, #tpu.memory_space<vmem>>, vector<1x8x128xf32>
    tpu.vector_store %arg5[%c0_9, %c0_10, %c0_11], %18 {strides = array<i32>} : memref<1x8x128xf32, #tpu.memory_space<vmem>>, vector<1x8x128xf32>,
    return
  }
  func.func @transform_0(%arg0: i32, %arg1: i32, %arg2: i32) -> (i32, i32, i32) {
    %c0_i32 = arith.constant 0 : i32
    %c0_i32_0 = arith.constant 0 : i32
    return %arg0, %arg1, %c0_i32 : i32, i32, i32
  }
  func.func @transform_1(%arg0: i32, %arg1: i32, %arg2: i32) -> (i32, i32, i32) {
    %c0_i32 = arith.constant 0 : i32
    %c0_i32_0 = arith.constant 0 : i32
    return %arg0, %arg2, %c0_i32 : i32, i32, i32
  }
  func.func @transform_2(%arg0: i32, %arg1: i32, %arg2: i32) -> (i32, i32, i32) {
    %c0_i32 = arith.constant 0 : i32
    return %arg0, %arg1, %arg2 : i32, i32, i32
  }
}

</mosaic_0001>

<bundles_post_ra>
// kernel: tpu_custom_call.1
= control target key start
LH: loop header
LB: loop body
LE: loop exit
PB: predicated region body
PF: predicated region fallthrough
CT: control target
= control target key end

     0   :  { %7 = vsyncpa [#allocation3], 0  ;;  %s1153_s0 = inlined_call_operand.vmem [shape: f32[2,8,32], index: 0, kind: input, shape index: {}]   ;;  %s1154_s1 = inlined_call_operand.vmem [shape: f32[2,128,32], index: 1, kind: input, shape index: {}]   ;;  %s1155_s2 = inlined_call_operand.hbm [shape: f32[2,8,128], index: 2, kind: output, shape index: {}]  }
   0x1   :  { %9 = vsyncpa [#allocation3 + $0x1], 0  ;;  %s883_s9 = smov 0   ;;  %s885_s10 = smov 0  }
   0x2   :  { %s887_s11 = smov 0   ;;  %s889_s12 = smov 0  }
   0x3   :  { %s891_s13 = smov 0   ;;  %s893_s14 = smov 0  }
   0x4 LB: > { %s577_s15 = sadd.s32 4294967295, %s862_s14   ;;  %s578_s16 = sadd.s32 4294967294, %s862_s14   ;;  %s862_s14 = sphi %s893_s14, %s15_s14   ;;  %s858_s13 = sphi %s891_s13, %s1164_s13   ;;  %s854_s12 = sphi %s889_s12, %s1163_s12   ;;  %s850_s11 = sphi %s887_s11, %s1162_s11   ;;  %s846_s10 = sphi %s885_s10, %s1161_s10   ;;  %s842_s9 = sphi %s883_s9, %s1160_s9  }
   0x5   : > { %s34_s17 = sadd.s32 1, %s858_s13  ;;  %s101_s18 = sadd.s32 1, %s850_s11 }
   0x6   : > { %p36_p0 = scmp.ge.s32.totalorder %s34_s17, 2  ;;  %p111_p1 = scmp.ne.s32.totalorder %s850_s11, %s846_s10 }
   0x7   : > { %p112_p2 = scmp.eq.s32.totalorder %s577_s15, 1  ;;  %p117_p3 = scmp.ne.s32.totalorder %s846_s10, %s842_s9 }
   0x8   : > { %s1166_s17 = smov (%p36_p0, %s34_s17), 0  ;;  %p118_p5 = scmp.eq.s32.totalorder %s578_s16, 1 }
   0x9   : > { %p923_p4 = por %p112_p2, %p111_p1  ;;  %s94_s20 = ssub.s32 %s858_s13, %s1166_s17 }
   0xa   : > { %p581_p6 = scmp.ge.s32.totalorder %s862_s14, 1  ;;  %p99_p7 = scmp.eq.s32.totalorder %s94_s20, 0 }
   0xb   : > { %p930_p8 = por %p118_p5, %p117_p3  ;;  %p159_p9 = scmp.lt.s32.totalorder %s862_s14, 3 }
   0xc   : > { %s936_s22 = scalar_select %p99_p7, %s850_s11, %s101_s18  }
   0xd   : > { %p160_p10 = pnand %p581_p6, %p159_p9 }
   0xe   : > { %p192_p11 = scmp.lt.s32.totalorder (!%p160_p10), %s854_s12, 1  ;;  %vm227_vm0 = vcmask (!%p160_p10), 261120   ;;  %v864_v50 = vmov (!%p160_p10), 0.0|0.0   ;;  %vm865_vm1 = vmmov (!%p160_p10), 0   ;;  %v866_v52 = vmov (!%p160_p10), 0.0   ;;  %s189_s4 = sand.u32 (!%p160_p10), 1, %s846_s10  }
   0xf   : > { %163 = sbr.rel (%p160_p10) target bundleno = 482 (0x1e2), region = 28  ;;  %660 = vmatprep.subr.bf16.mxu0 (!%p160_p10), %v864_v50  ;;  %657 = vmatprep.mubr.msk.f32.mxu0 (!%p160_p10), %vm865_vm1, %v866_v52  ;;  %vm1058_vm2 = vmpackc.low (!%p160_p10), %vm227_vm0, %vm227_vm0  ;;  %s582_s5 = sshll.u32 (!%p160_p10), %s189_s4, 3 }
  0x10   : > { %s191_s6 = scalar_lea.vmem (!%p160_p10), [#allocation2], %s582_s5  ;;  %s604_s8 = sshll.u32 (!%p160_p10), %s854_s12, 7 }
  0x11   : > { %s484_s7 = sshll.u32 (!%p160_p10), %s191_s6, 4  ;;  %s1108_s18 = scalar_lea.hbm (!%p160_p10), %s1155_s2, %s604_s8  ;;  %s1103_s7 = int_to_ptr.vmem [resolvable:$true] %s484_s7 }
  0x12   : > { %s469_s20 = scalar_lea.sflag (!%p160_p10), [#allocation3], %s189_s4 }
  0x16   : > { %s940_s23 = scalar_select %p192_p11, %s854_s12, 1 }
  0x17   : > { %s867_s12 = smov [#allocation2]  }
  0x18   : > { %s607_s24 = sshll.u32 %s940_s23, 7  ;;  %s583_s28 = sshll.u32 %s940_s23, 3 }
  0x19   : > { %s946_s27 = scalar_lea.vmem %s1154_s1, %s607_s24  ;;  %s198_s3 = scalar_lea.vmem %s1153_s0, %s583_s28 }
  0x1a   : > { %v949_v0 = vld [vmem:[%s946_s27] sm:$0xff]  ;;  %v952_v1 = vld [vmem:[%s946_s27 + $0x10] sm:$0xff]  ;;  %v955_v2 = vld [vmem:[%s946_s27 + $0x8] sm:$0xff]  ;;  %s784_s23 = scalar_lea.vmem %s1103_s7, 128  ;;  %s788_s24 = sshll.u32 %s867_s12, 4  ;;  %s789_s24 = int_to_ptr.vmem [resolvable:$false] %s788_s24 }
  0x1b   : > { %v233_v3 = vmul.f32 %v949_v0, %v949_v0  ;;  %v235_v4 = vmul.f32 %v952_v1, %v952_v1  ;;  %v234_v5 = vmul.f32 %v955_v2, %v955_v2  ;;  %v964_v6 = vld [vmem:[%s946_s27 + $0x18] sm:$0xff]  ;;  %v969_v8 = vld [vmem:[%s946_s27 + $0x28] sm:$0xff]  ;;  %v972_v9 = vld [vmem:[%s946_s27 + $0x20] sm:$0xff]  ;;  %p785_p12 = scmp.ne.s32.totalorder %s1103_s7, %s784_s23  ;;  %s790_s25 = scalar_lea.vmem %s789_s24, 256 }
  0x1c   : > { %v236_v7 = vmul.f32 %v964_v6, %v964_v6  ;;  %v238_v14 = vmul.f32 %v969_v8, %v969_v8  ;;  %v237_v15 = vmul.f32 %v972_v9, %v972_v9  ;;  %v983_v16 = vld [vmem:[%s946_s27 + $0x38] sm:$0xff]  ;;  %v986_v17 = vld [vmem:[%s946_s27 + $0x30] sm:$0xff]  ;;  %v995_v22 = vld [vmem:[%s946_s27 + $0x48] sm:$0xff]  ;;  %p791_p1 = scmp.lt.s32.totalorder %s1103_s7, %s789_s24  ;;  %p792_p2 = scmp.lt.s32.totalorder %s790_s25, %s784_s23 }
  0x1d   : > { %v249_v10 = vsel %vm227_vm0, %v233_v3, 0.0  ;;  %v255_v11 = vsel %vm227_vm0, %v235_v4, 0.0  ;;  %v252_v12 = vsel %vm227_vm0, %v234_v5, 0.0  ;;  %v240_v20 = vmul.f32 %v983_v16, %v983_v16  ;;  %v998_v23 = vld [vmem:[%s946_s27 + $0x40] sm:$0xff]  ;;  %v1007_v28 = vld [vmem:[%s946_s27 + $0x58] sm:$0xff]  ;;  %v1010_v29 = vld [vmem:[%s946_s27 + $0x50] sm:$0xff]  ;;  %p786_p13 = pnand %p785_p12, %p923_p4 }
  0x1e   : > { %250 = vadd.xlane.f32.xlu0 %v249_v10  ;;  %256 = vadd.xlane.f32.xlu1 %v255_v11  ;;  %v258_v13 = vsel %vm227_vm0, %v236_v7, 0.0  ;;  %v264_v18 = vsel %vm227_vm0, %v238_v14, 0.0  ;;  %v261_v19 = vsel %vm227_vm0, %v237_v15, 0.0  ;;  %v239_v21 = vmul.f32 %v986_v17, %v986_v17  ;;  %v1019_v34 = vld [vmem:[%s946_s27 + $0x68] sm:$0xff]  ;;  %v1022_v35 = vld [vmem:[%s946_s27 + $0x60] sm:$0xff]  ;;  %v1032_v40 = vld [vmem:[%s946_s27 + $0x78] sm:$0xff]  ;;  %p793_p3 = por %p792_p2, %p791_p1 }
  0x1f   : > { %v270_v24 = vsel %vm227_vm0, %v240_v20, 0.0  ;;  %v242_v26 = vmul.f32 %v995_v22, %v995_v22  ;;  %v241_v27 = vmul.f32 %v998_v23, %v998_v23  ;;  %v244_v32 = vmul.f32 %v1007_v28, %v1007_v28  ;;  %v1035_v41 = vld [vmem:[%s946_s27 + $0x70] sm:$0xff]  ;;  %v1046_v46 = vld [vmem:[%s198_s3] sm:$0xff]  ;;  %p787_p0 = pneg %p786_p13 }
  0x20   : > { %v267_v25 = vsel %vm227_vm0, %v239_v21, 0.0  ;;  %v243_v33 = vmul.f32 %v1010_v29, %v1010_v29  ;;  %v246_v38 = vmul.f32 %v1019_v34, %v1019_v34  ;;  %v245_v39 = vmul.f32 %v1022_v35, %v1022_v35 }
  0x21   : > { %v276_v30 = vsel %vm227_vm0, %v242_v26, 0.0  ;;  %v273_v31 = vsel %vm227_vm0, %v241_v27, 0.0  ;;  %v282_v36 = vsel %vm227_vm0, %v244_v32, 0.0  ;;  %v248_v44 = vmul.f32 %v1032_v40, %v1032_v40  ;;  %p794_p5 = pnand %p793_p3, %p787_p0 }
  0x22   : > { %253 = vadd.xlane.f32.xlu0 %v252_v12  ;;  %259 = vadd.xlane.f32.xlu1 %v258_v13  ;;  %v279_v37 = vsel %vm227_vm0, %v243_v33, 0.0  ;;  %v288_v42 = vsel %vm227_vm0, %v246_v38, 0.0  ;;  %v285_v43 = vsel %vm227_vm0, %v245_v39, 0.0  ;;  %v247_v45 = vmul.f32 %v1035_v41, %v1035_v41 }
  0x23   : > { %v294_v47 = vsel %vm227_vm0, %v248_v44, 0.0  ;;  %v226_v49 = vmul.f32 %v1046_v46, %v1046_v46 }
  0x24   : > { %v291_v48 = vsel %vm227_vm0, %v247_v45, 0.0 }
  0x25   : > { %v228_v51 = vsel %vm227_vm0, %v226_v49, 0.0 }
  0x26   : > { %265 = vadd.xlane.f32.xlu1 %v264_v18  ;;  %262 = vadd.xlane.f32.xlu0 %v261_v19 }
  0x2a   : > { %271 = vadd.xlane.f32.xlu1 %v270_v24  ;;  %268 = vadd.xlane.f32.xlu0 %v267_v25 }
  0x2e   : > { %277 = vadd.xlane.f32.xlu1 %v276_v30  ;;  %274 = vadd.xlane.f32.xlu0 %v273_v31 }
  0x32   : > { %283 = vadd.xlane.f32.xlu1 %v282_v36  ;;  %280 = vadd.xlane.f32.xlu0 %v279_v37 }
  0x36   : > { %289 = vadd.xlane.f32.xlu1 %v288_v42  ;;  %286 = vadd.xlane.f32.xlu0 %v285_v43 }
  0x3a   : > { %295 = vadd.xlane.f32.xlu1 %v294_v47  ;;  %292 = vadd.xlane.f32.xlu0 %v291_v48 }
  0x3e   : > { %229 = vadd.xlane.f32.xlu0 %v228_v51 }
  0xab   : > { %v251_v53 = vpop.xlane.xlu0 %250  ;;  %v257_v54 = vpop.xlane.xlu1 %256 }
  0xac   : > { %v297_v55 = vadd.f32 1e-16, %v251_v53  ;;  %v299_v59 = vadd.f32 1e-16, %v257_v54 }
  0xae   : > { %750 = vrsqrt.f32 %v297_v55 }
  0xaf   : > { %v254_v56 = vpop.xlane.xlu0 %253  ;;  %v260_v57 = vpop.xlane.xlu1 %259 }
  0xb0   : > { %v298_v58 = vadd.f32 1e-16, %v254_v56  ;;  %v300_v60 = vadd.f32 1e-16, %v260_v57 }
  0xb2   : > { %752 = vrsqrt.f32 %v298_v58 }
  0xb3   : > { %v266_v61 = vpop.xlane.xlu1 %265  ;;  %754 = vrsqrt.f32 %v299_v59  ;;  %v263_v62 = vpop.xlane.xlu0 %262 }
  0xb4   : > { %756 = vrsqrt.f32 %v300_v60  ;;  %v302_v63 = vadd.f32 1e-16, %v266_v61  ;;  %v301_v3 = vadd.f32 1e-16, %v263_v62 }
  0xb6   : > { %758 = vrsqrt.f32 %v302_v63 }
  0xb7   : > { %760 = vrsqrt.f32 %v301_v3  ;;  %v272_v7 = vpop.xlane.xlu1 %271  ;;  %v269_v12 = vpop.xlane.xlu0 %268 }
  0xb8   : > { %v751_v4 = vpop.eup %750  ;;  %v304_v18 = vadd.f32 1e-16, %v272_v7  ;;  %v303_v20 = vadd.f32 1e-16, %v269_v12 }
  0xb9   : > { %v330_v10 = vmul.f32 %v751_v4, %v949_v0 }
  0xba   : > { %762 = vrsqrt.f32 %v304_v18 }
  0xbb   : > { %764 = vrsqrt.f32 %v303_v20  ;;  %v278_v21 = vpop.xlane.xlu1 %277  ;;  %v275_v25 = vpop.xlane.xlu0 %274 }
  0xbc   : > { %v753_v5 = vpop.eup %752  ;;  %v306_v30 = vadd.f32 1e-16, %v278_v21  ;;  %v305_v31 = vadd.f32 1e-16, %v275_v25 }
  0xbd   : > { %v331_v11 = vmul.f32 %v753_v5, %v955_v2  ;;  %v755_v14 = vpop.eup %754 }
  0xbe   : > { %v757_v19 = vpop.eup %756  ;;  %v332_v0 = vmul.f32 %v755_v14, %v952_v1  ;;  %766 = vrsqrt.f32 %v306_v30 }
  0xbf   : > { %v661_v15 = vpack.c.bf16 %v331_v11, %v330_v10  ;;  %v333_v2 = vmul.f32 %v757_v19, %v964_v6  ;;  %768 = vrsqrt.f32 %v305_v31  ;;  %v284_v1 = vpop.xlane.xlu1 %283  ;;  %v281_v37 = vpop.xlane.xlu0 %280 }
  0xc0   : > { %v759_v24 = vpop.eup %758  ;;  %v308_v39 = vadd.f32 1e-16, %v284_v1  ;;  %v307_v42 = vadd.f32 1e-16, %v281_v37 }
  0xc1   : > { %663 = vmatpush3.bf16.xpose.msk.msra.mxu0 %vm1058_vm2, %v661_v15  ;;  %v761_v26 = vpop.eup %760  ;;  %v665_v27 = vpack.c.bf16 %v333_v2, %v332_v0  ;;  %v335_v33 = vmul.f32 %v759_v24, %v969_v8 }
  0xc2   : > { %664 = vmatprep.subr.bf16.mxu0 %v864_v50  ;;  %v334_v32 = vmul.f32 %v761_v26, %v972_v9  ;;  %770 = vrsqrt.f32 %v308_v39 }
  0xc3   : > { %772 = vrsqrt.f32 %v307_v42  ;;  %v290_v8 = vpop.xlane.xlu1 %289  ;;  %v287_v47 = vpop.xlane.xlu0 %286 }
  0xc4   : > { %v763_v6 = vpop.eup %762  ;;  %v669_v36 = vpack.c.bf16 %v335_v33, %v334_v32  ;;  %v310_v49 = vadd.f32 1e-16, %v290_v8  ;;  %v309_v51 = vadd.f32 1e-16, %v287_v47 }
  0xc5   : > { %v765_v38 = vpop.eup %764  ;;  %v337_v9 = vmul.f32 %v763_v6, %v983_v16 }
  0xc6   : > { %v336_v43 = vmul.f32 %v765_v38, %v986_v17  ;;  %774 = vrsqrt.f32 %v310_v49 }
  0xc7   : > { %776 = vrsqrt.f32 %v309_v51  ;;  %v296_v16 = vpop.xlane.xlu1 %295  ;;  %v293_v55 = vpop.xlane.xlu0 %292 }
  0xc8   : > { %v767_v44 = vpop.eup %766  ;;  %v673_v45 = vpack.c.bf16 %v337_v9, %v336_v43  ;;  %v312_v57 = vadd.f32 1e-16, %v296_v16  ;;  %v311_v58 = vadd.f32 1e-16, %v293_v55 }
  0xc9   : > { %667 = vmatpush3.bf16.xpose.msk.msra.mxu0 %vm1058_vm2, %v665_v27  ;;  %v769_v48 = vpop.eup %768  ;;  %v339_v17 = vmul.f32 %v767_v44, %v995_v22 }
  0xca   : > { %668 = vmatprep.subr.bf16.mxu0 %v864_v50  ;;  %v338_v52 = vmul.f32 %v769_v48, %v998_v23  ;;  %778 = vrsqrt.f32 %v312_v57 }
  0xcb   : > { %780 = vrsqrt.f32 %v311_v58  ;;  %v230_v62 = vpop.xlane.xlu0 %229 }
  0xcc   : > { %v771_v53 = vpop.eup %770  ;;  %v677_v54 = vpack.c.bf16 %v339_v17, %v338_v52 }
  0xcd   : > { %v773_v56 = vpop.eup %772  ;;  %v341_v23 = vmul.f32 %v771_v53, %v1007_v28 }
  0xce   : > { %v340_v59 = vmul.f32 %v773_v56, %v1010_v29  ;;  %v231_v29 = vadd.f32 1e-16, %v230_v62 }
  0xd0   : > { %v775_v22 = vpop.eup %774  ;;  %v681_v60 = vpack.c.bf16 %v341_v23, %v340_v59  ;;  %782 = vrsqrt.f32 %v231_v29 }
  0xd1   : > { %671 = vmatpush3.bf16.xpose.msk.msra.mxu0 %vm1058_vm2, %v669_v36  ;;  %v777_v61 = vpop.eup %776  ;;  %v343_v3 = vmul.f32 %v775_v22, %v1019_v34 }
  0xd2   : > { %672 = vmatprep.subr.bf16.mxu0 %v864_v50  ;;  %v342_v63 = vmul.f32 %v777_v61, %v1022_v35 }
  0xd4   : > { %v779_v28 = vpop.eup %778  ;;  %v685_v4 = vpack.c.bf16 %v343_v3, %v342_v63 }
  0xd5   : > { %v781_v5 = vpop.eup %780  ;;  %v345_v10 = vmul.f32 %v779_v28, %v1032_v40 }
  0xd6   : > { %v344_v7 = vmul.f32 %v781_v5, %v1035_v41 }
  0xd8   : > { %v689_v35 = vpack.c.bf16 %v345_v10, %v344_v7 }
  0xd9   : > { %675 = vmatpush3.bf16.xpose.msk.msra.mxu0 %vm1058_vm2, %v673_v45 }
  0xda   : > { %676 = vmatprep.subr.bf16.mxu0 %v864_v50  ;;  %v783_v34 = vpop.eup %782 }
  0xdb   : > { %v329_v11 = vmul.f32 %v783_v34, %v1046_v46 }
  0xe1   : > { %679 = vmatpush3.bf16.xpose.msk.msra.mxu0 %vm1058_vm2, %v677_v54 }
  0xe2   : > { %680 = vmatprep.subr.bf16.mxu0 %v864_v50 }
  0xe9   : > { %683 = vmatpush3.bf16.xpose.msk.msra.mxu0 %vm1058_vm2, %v681_v60 }
  0xea   : > { %684 = vmatprep.subr.bf16.mxu0 %v864_v50 }
  0xf1   : > { %687 = vmatpush3.bf16.xpose.msk.msra.mxu0 %vm1058_vm2, %v685_v4 }
  0xf2   : > { %688 = vmatprep.subr.bf16.mxu0 %v864_v50 }
  0xf9   : > { %691 = vmatpush3.bf16.xpose.msk.msra.mxu0 %vm1058_vm2, %v689_v35 }
 0x100   : > { %658 = vmatmul.mubr.msk.f32.vlgmr.msra.gmra.mrb[0].mxu0 %vm227_vm0, %v329_v11 }
 0x1d3   : > { %v463_v40 = vpop.f32.mrb[0].mxu0 }
 0x1d4   : > { %467 = vst [vmem:[%s191_s6] sm:$0xff] %v463_v40  ;;  %v659_v41 = vpop.f32.mrb[1].mxu0 }
 0x1d5   : > { %797 = shalt.err (!%p794_p5)
}
 0x1d6   : > { %s798_s26 = scalar_lea.hbm %s1108_s18, 128  ;;  %s802_s29 = scalar_lea.hbm %s1155_s2, 256 }
 0x1d7   : > { %p799_p6 = scmp.ne.s32.totalorder %s1108_s18, %s798_s26  ;;  %p803_p10 = scmp.lt.u32.totalorder %s1108_s18, %s1155_s2 }
 0x1d8   : > { %p804_p11 = scmp.lt.u32.totalorder %s802_s29, %s798_s26  ;;  %p806_p13 = scmp.lt.u32.totalorder %s798_s26, %s1108_s18 }
 0x1d9   : > { %p800_p7 = pnand %p799_p6, %p923_p4 }
 0x1da   : > { %p805_p12 = por %p804_p11, %p803_p10 }
 0x1db   : > { %p801_p9 = pneg %p800_p7 }
 0x1dc   : > { %p807_p0 = por %p806_p13, %p805_p12 }
 0x1de   : > { %p808_p1 = pnand %p807_p0, %p801_p9 }
 0x1e0   : > { %811 = shalt.err (!%p808_p1)
}
 0x1e1   : > { %692 = dma.vmem_to_hbm [thread:$0]  (%p923_p4), %s1103_s7, 128, %s1108_s18, %s469_s20  }
 0x1e2 PF: > { %p698_p2 = scmp.ge.s32.totalorder %s862_s14, 2  ;;  %s496_s4 = sand.u32 1, %s842_s9  }
 0x1e3   : > { %s497_s5 = scalar_lea.sflag [#allocation3], %s496_s4 }
 0x1e4   : > { %p695_p3 = pnand %p698_p2, %p930_p8 }
 0x1e6   : > { %837 = dma.done.wait (!%p695_p3), %s497_s5, 128  }
 0x1e7   : > { %839 = vsyncadd (!%p695_p3), %s497_s5, 4294967168  ;;  %s15_s14 = sadd.s32 1, %s862_s14   ;;  %s1160_s9 = smov %s846_s10 }
 0x1e8   : > { %p12_p5 = scmp.ge.s32.totalorder %s15_s14, 4   ;;  %s1161_s10 = smov %s850_s11 }
 0x1e9   : > { %s1162_s11 = smov %s936_s22  ;;  %s1163_s12 = smov %s858_s13 }
 0x1ea   : > { %s1164_s13 = smov %s1166_s17  ;;  %14 = sbr.rel (!%p12_p5) target bundleno = 4 (0x4), region = 66 }
 0x1f1   :  { %502 = vsyncpa [#allocation3], 1 }
 0x1f2   :  { %504 = vsyncpa [#allocation3 + $0x1], 1 }

</bundles_post_ra>
